<compile_context>
chip_gen: v6e
topology: v6e:2x2x1
jax: 0.10.0
libtpu: 0.0.40
codegen_flags: <defaults>
</compile_context>

<pallas_src>
import functools
import math

import jax
import jax.numpy as jnp
from jax.experimental import pallas as pl
from jax.experimental.pallas import tpu as pltpu


def _round_up(x, m):
    return ((x + m - 1) // m) * m


def _vmem_limit_bytes():
    # Conservative default works on every generation (v7x: 64 MiB physical /
    # 32 MiB scoped).  On v5e/v6e (128 MiB physical) raise it so bigger tiles
    # amortize the ~0.35 us per-grid-step overhead.
    try:
        info = pltpu.get_tpu_info()
        if info.vmem_capacity_bytes >= 100 * 1024 * 1024:
            return 64 * 1024 * 1024
    except Exception:
        pass
    return 32 * 1024 * 1024


# --------------------------------------------------------------------------
# ndim >= 3 path: classes on sublanes, flattened spatial on lanes.
# --------------------------------------------------------------------------
def _ce_kernel_nd(total_lanes, accumulate, y_pred_ref, y_true_ref, out_ref):
    j = pl.program_id(1)
    tile_l = y_pred_ref.shape[-1]

    logits = y_pred_ref[...].astype(jnp.float32)       # (1, C, tile_l)
    targets = y_true_ref[...].astype(jnp.float32)      # (1, C, tile_l)

    # log_softmax elided:
    #   -sum_c t*(x - m - lse) = (m + lse) * sum_c(t) - sum_c(t * x)
    m = jnp.max(logits, axis=1, keepdims=True)                         # (1,1,L)
    lse = jnp.log(jnp.sum(jnp.exp(logits - m), axis=1, keepdims=True))
    t_sum = jnp.sum(targets, axis=1, keepdims=True)
    t_dot = jnp.sum(targets * logits, axis=1, keepdims=True)
    loss = (m + lse) * t_sum - t_dot                                   # (1,1,L)

    if total_lanes % tile_l != 0:      # static: a ragged last lane-tile exists
        lane = jax.lax.broadcasted_iota(jnp.int32, loss.shape, dimension=2)
        loss = jnp.where(j * tile_l + lane < total_lanes, loss, 0.0)

    if accumulate:
        @pl.when(j == 0)
        def _():
            out_ref[...] = jnp.zeros_like(out_ref)
        out_ref[...] += loss
    else:
        out_ref[...] = loss.reshape(out_ref.shape)


def _ce_nd(y_pred, y_true, max_lane_tile=None):
    n, c = int(y_pred.shape[0]), int(y_pred.shape[1])
    l = int(math.prod(y_pred.shape[2:]))
    p3 = y_pred.reshape(n, c, l)        # trailing-dim merge: no HBM copy
    t3 = y_true.reshape(n, c, l)

    itemsize = max(jnp.dtype(y_pred.dtype).itemsize,
                   jnp.dtype(y_true.dtype).itemsize)
    vmem_limit = _vmem_limit_bytes()
    budget = int(0.6 * vmem_limit)

    # Per-lane resident bytes: 2 inputs x 2 pipeline buffers at the HBM dtype
    # + ~5 live f32 (C,)-wide temps + small (1,)-wide stats / output buffers.
    per_lane = c * (4 * itemsize + 5 * 4) + 64
    if per_lane * 128 > budget:
        # Vocab-scale C: the sublane-resident class layout cannot fit even one
        # 128-lane tile.  Fall back to the class-tiled 2D path (costs one HBM
        # transpose but bounds VMEM and keeps double-buffering alive).
        flat_p = jnp.moveaxis(p3, 1, 2).reshape(n * l, c)
        flat_t = jnp.moveaxis(t3, 1, 2).reshape(n * l, c)
        return _ce_2d(flat_p, flat_t)

    tile_l = min(_round_up(l, 128),
                 max(128, (budget // per_lane) // 128 * 128))
    if max_lane_tile is not None:       # testing hook
        tile_l = min(tile_l, max(128, (int(max_lane_tile) // 128) * 128))
    num_j = pl.cdiv(l, tile_l)
    assert per_lane * tile_l <= vmem_limit

    # N >= 2: batch axis alone feeds both v7x TensorCores -> keep the cheap
    # resident accumulator (no extra HBM writeback).  N == 1: give every
    # (i, j) its own output slab so the lane-tile axis can be sharded too.
    accumulate = n >= 2

    kernel = functools.partial(_ce_kernel_nd, l, accumulate)
    in_specs = [pl.BlockSpec((1, c, tile_l), lambda i, j: (i, 0, j)),
                pl.BlockSpec((1, c, tile_l), lambda i, j: (i, 0, j))]

    if accumulate:
        out_shape = jax.ShapeDtypeStruct((n, 1, tile_l), jnp.float32)
        out_specs = pl.BlockSpec((1, 1, tile_l), lambda i, j: (i, 0, 0))
        semantics = ("parallel", "arbitrary")
    else:
        out_shape = jax.ShapeDtypeStruct((n, num_j * tile_l), jnp.float32)
        out_specs = pl.BlockSpec((1, tile_l), lambda i, j: (i, j))
        semantics = ("parallel", "parallel")

    partial = pl.pallas_call(
        kernel,
        out_shape=out_shape,
        grid_spec=pltpu.PrefetchScalarGridSpec(
            num_scalar_prefetch=0,
            grid=(n, num_j),
            in_specs=in_specs,
            out_specs=out_specs,
        ),
        compiler_params=pltpu.CompilerParams(
            dimension_semantics=semantics,
            vmem_limit_bytes=vmem_limit,
        ),
    )(p3, t3)

    # single tree-reduction + mean in f32, outside the hot loop
    return jnp.sum(partial) / jnp.float32(n * l)


# --------------------------------------------------------------------------
# ndim == 2 path: classes on lanes, class axis tiled with an online LSE.
# --------------------------------------------------------------------------
def _ce_kernel_2d(total_rows, total_cls, y_pred_ref, y_true_ref, out_ref,
                  m_sc, s_sc, dot_sc, tsum_sc):
    i = pl.program_id(0)
    k = pl.program_id(1)
    tile_r, tile_c = y_pred_ref.shape

    @pl.when(k == 0)
    def _():
        m_sc[...] = jnp.full_like(m_sc, -jnp.inf)
        s_sc[...] = jnp.zeros_like(s_sc)
        dot_sc[...] = jnp.zeros_like(dot_sc)
        tsum_sc[...] = jnp.zeros_like(tsum_sc)

    logits = y_pred_ref[...].astype(jnp.float32)       # (tile_r, tile_c)
    targets = y_true_ref[...].astype(jnp.float32)

    if total_cls % tile_c != 0:        # static: a ragged last class-tile exists
        col = jax.lax.broadcasted_iota(jnp.int32, logits.shape, dimension=1)
        valid = (k * tile_c + col) < total_cls
        logits_lse = jnp.where(valid, logits, -jnp.inf)
        dot_part = jnp.where(valid, targets * logits, 0.0)
        tgt_part = jnp.where(valid, targets, 0.0)
    else:
        logits_lse = logits
        dot_part = targets * logits
        tgt_part = targets

    # Online logsumexp over class tiles (per-row stats live in VMEM scratch).
    blk_max = jnp.max(logits_lse, axis=-1, keepdims=True)        # (tile_r, 1)
    m_new = jnp.maximum(m_sc[...], blk_max)
    s_sc[...] = s_sc[...] * jnp.exp(m_sc[...] - m_new) + jnp.sum(
        jnp.exp(logits_lse - m_new), axis=-1, keepdims=True)
    dot_sc[...] += jnp.sum(dot_part, axis=-1, keepdims=True)
    tsum_sc[...] += jnp.sum(tgt_part, axis=-1, keepdims=True)
    m_sc[...] = m_new

    @pl.when(k == pl.num_programs(1) - 1)
    def _():
        loss = (m_sc[...] + jnp.log(s_sc[...])) * tsum_sc[...] - dot_sc[...]
        if total_rows % tile_r != 0:   # row mask: once per row block, not per k
            row = jax.lax.broadcasted_iota(jnp.int32, loss.shape, dimension=0)
            loss = jnp.where(i * tile_r + row < total_rows, loss, 0.0)
        out_ref[...] = loss.reshape(out_ref.shape)


def _ce_2d(y_pred, y_true, max_class_tile=None, max_row_tile=None):
    rows, c = int(y_pred.shape[0]), int(y_pred.shape[1])
    itemsize = max(jnp.dtype(y_pred.dtype).itemsize,
                   jnp.dtype(y_true.dtype).itemsize)
    vmem_limit = _vmem_limit_bytes()
    budget = int(0.6 * vmem_limit)

    per_elem = 4 * itemsize + 4 * 4     # 2 in x 2 buffers + ~4 live f32 temps
    # Class tile: full C if it fits alongside >= 8 rows, else a multiple of 128.
    cap_c = max(128, (budget // (per_elem * 8)) // 128 * 128)
    if max_class_tile is not None:      # testing hook
        cap_c = min(cap_c, max(128, (int(max_class_tile) // 128) * 128))
    tile_c = c if c <= cap_c else cap_c
    num_k = pl.cdiv(c, tile_c)

    per_row = per_elem * tile_c + 4 * 128 * 4   # + lane-padded per-row stats
    tile_r = max(8, min(_round_up(rows, 8), (budget // per_row) // 8 * 8))
    if max_row_tile is not None:        # testing hook
        tile_r = min(tile_r, max(8, (int(max_row_tile) // 8) * 8))
    num_i = pl.cdiv(rows, tile_r)
    assert per_row * tile_r <= vmem_limit

    partial = pl.pallas_call(
        functools.partial(_ce_kernel_2d, rows, c),
        out_shape=jax.ShapeDtypeStruct((num_i, tile_r, 1), jnp.float32),
        grid_spec=pltpu.PrefetchScalarGridSpec(
            num_scalar_prefetch=0,
            grid=(num_i, num_k),
            in_specs=[
                pl.BlockSpec((tile_r, tile_c), lambda i, k: (i, k)),
                pl.BlockSpec((tile_r, tile_c), lambda i, k: (i, k)),
            ],
            out_specs=pl.BlockSpec((1, tile_r, 1), lambda i, k: (i, 0, 0)),
            scratch_shapes=[pltpu.VMEM((tile_r, 1), jnp.float32)] * 4,
        ),
        compiler_params=pltpu.CompilerParams(
            dimension_semantics=("parallel", "arbitrary"),
            vmem_limit_bytes=vmem_limit,
        ),
    )(y_pred, y_true)

    return jnp.sum(partial) / jnp.float32(rows)


# --------------------------------------------------------------------------
# Public wrapper (matches CustomCrossEntropyLoss.forward semantics).
# --------------------------------------------------------------------------
def custom_cross_entropy_loss(y_pred, y_true, *, _max_lane_tile=None,
                              _max_class_tile=None, _max_row_tile=None):
    assert y_pred.shape == y_true.shape, "y_pred and y_true must match"
    if y_pred.ndim < 2:
        raise ValueError("expected at least 2-D input with class dim at axis 1")
    if y_pred.ndim == 2:
        return _ce_2d(y_pred, y_true, max_class_tile=_max_class_tile,
                      max_row_tile=_max_row_tile)
    return _ce_nd(y_pred, y_true, max_lane_tile=_max_lane_tile)


def _reference(y_pred, y_true):
    logp = jax.nn.log_softmax(y_pred.astype(jnp.float32), axis=1)
    loss = -jnp.sum(y_true.astype(jnp.float32) * logp, axis=1)
    return jnp.mean(loss)


if __name__ == "__main__":
    key = jax.random.PRNGKey(0)
    k1, k2, k3, k4 = jax.random.split(key, 4)

    # 1) Primary: NCHW logits + soft-label targets (accumulator mode, N=2).
    y_pred = jax.random.normal(k1, (2, 4, 16, 16), dtype=jnp.float32)
    y_true = jax.nn.softmax(
        jax.random.normal(k2, (2, 4, 16, 16), dtype=jnp.float32), axis=1)
    loss = jax.block_until_ready(custom_cross_entropy_loss(y_pred, y_true))
    ref = _reference(y_pred, y_true)
    assert jnp.allclose(loss, ref, rtol=1e-5, atol=1e-5), (loss, ref)

    # 1b) Same data, forced small lane tiles -> multi-step accumulation over j.
    loss = jax.block_until_ready(
        custom_cross_entropy_loss(y_pred, y_true, _max_lane_tile=128))
    assert jnp.allclose(loss, ref, rtol=1e-5, atol=1e-5), (loss, ref)

    # 2) Odd spatial size (H*W = 35) -> partial-tile lane masking.
    y_pred_b = jax.random.normal(k3, (2, 4, 5, 7), dtype=jnp.float32)
    y_true_b = jax.nn.softmax(
        jax.random.normal(k4, (2, 4, 5, 7), dtype=jnp.float32), axis=1)
    loss_b = jax.block_until_ready(custom_cross_entropy_loss(y_pred_b, y_true_b))
    ref_b = _reference(y_pred_b, y_true_b)
    assert jnp.allclose(loss_b, ref_b, rtol=1e-5, atol=1e-5), (loss_b, ref_b)

    # 3) N == 1 with forced lane tiling -> fully-parallel per-block outputs.
    y_pred_c = jax.random.normal(k1, (1, 4, 16, 16), dtype=jnp.float32)
    y_true_c = jax.nn.softmax(
        jax.random.normal(k2, (1, 4, 16, 16), dtype=jnp.float32), axis=1)
    loss_c = jax.block_until_ready(
        custom_cross_entropy_loss(y_pred_c, y_true_c, _max_lane_tile=128))
    ref_c = _reference(y_pred_c, y_true_c)
    assert jnp.allclose(loss_c, ref_c, rtol=1e-5, atol=1e-5), (loss_c, ref_c)

    # 4) 2-D (rows, C) path, non-multiple-of-8 rows -> row masking.
    y_pred_d = jax.random.normal(k1, (10, 32), dtype=jnp.float32)
    y_true_d = jax.nn.softmax(
        jax.random.normal(k2, (10, 32), dtype=jnp.float32), axis=1)
    loss_d = jax.block_until_ready(custom_cross_entropy_loss(y_pred_d, y_true_d))
    ref_d = _reference(y_pred_d, y_true_d)
    assert jnp.allclose(loss_d, ref_d, rtol=1e-5, atol=1e-5), (loss_d, ref_d)

    # 5) 2-D path with forced class/row tiling -> online LSE across class
    #    blocks + ragged class and row masking (vocab-scale C code path).
    y_pred_e = jax.random.normal(k3, (40, 300), dtype=jnp.float32)
    y_true_e = jax.nn.softmax(
        jax.random.normal(k4, (40, 300), dtype=jnp.float32), axis=1)
    loss_e = jax.block_until_ready(custom_cross_entropy_loss(
        y_pred_e, y_true_e, _max_class_tile=128, _max_row_tile=16))
    ref_e = _reference(y_pred_e, y_true_e)
    assert jnp.allclose(loss_e, ref_e, rtol=1e-5, atol=1e-5), (loss_e, ref_e)

    # 6) bf16 HBM-resident inputs (kernel upcasts internally).
    y_pred_f = y_pred.astype(jnp.bfloat16)
    y_true_f = y_true.astype(jnp.bfloat16)
    loss_f = jax.block_until_ready(custom_cross_entropy_loss(y_pred_f, y_true_f))
    ref_f = _reference(y_pred_f, y_true_f)
    assert jnp.allclose(loss_f, ref_f, rtol=2e-2, atol=2e-2), (loss_f, ref_f)

    print("KERNEL_OK")
</pallas_src>

<mosaic_0001>
module attributes {stable_mosaic.version = 11 : i64} {
  func.func @_ce_kernel_nd(%arg0: i32, %arg1: i32, %arg2: memref<1x4x256xf32, #tpu.memory_space<vmem>>, %arg3: memref<1x4x256xf32, #tpu.memory_space<vmem>>, %arg4: memref<1x1x256xf32, #tpu.memory_space<vmem>>) attributes {dimension_semantics = [#tpu.dimension_semantics<parallel>, #tpu.dimension_semantics<arbitrary>], iteration_bounds = array<i64: 2, 1>, scalar_prefetch = 0 : i64, scratch_operands = 0 : i64, tpu.core_type = #tpu.core_type<tc>, window_params = [{transform_indices = @transform_0, window_bounds = array<i64: 1, 4, 256>}, {transform_indices = @transform_1, window_bounds = array<i64: 1, 4, 256>}, {transform_indices = @transform_2, window_bounds = array<i64: 1, 1, 256>}]} {
    %c0 = arith.constant 0 : index
    %c0_0 = arith.constant 0 : index
    %c0_1 = arith.constant 0 : index
    %0 = vector.load %arg2[%c0, %c0_0, %c0_1] : memref<1x4x256xf32, #tpu.memory_space<vmem>>, vector<1x4x256xf32>
    %c0_2 = arith.constant 0 : index
    %c0_3 = arith.constant 0 : index
    %c0_4 = arith.constant 0 : index
    %1 = vector.load %arg3[%c0_2, %c0_3, %c0_4] : memref<1x4x256xf32, #tpu.memory_space<vmem>>, vector<1x4x256xf32>
    %cst = arith.constant dense<0xFF800000> : vector<1x256xf32>
    %2 = vector.multi_reduction <maximumf>, %0, %cst [1] : vector<1x4x256xf32> to vector<1x256xf32>
    %3 = vector.shape_cast %2 : vector<1x256xf32> to vector<1x1x256xf32>
    %4 = vector.broadcast %3 : vector<1x1x256xf32> to vector<1x4x256xf32>
    %5 = arith.subf %0, %4 : vector<1x4x256xf32>
    %6 = math.exp %5 : vector<1x4x256xf32>
    %cst_5 = arith.constant dense<0.000000e+00> : vector<1x256xf32>
    %7 = vector.multi_reduction <add>, %6, %cst_5 [1] : vector<1x4x256xf32> to vector<1x256xf32>
    %8 = vector.shape_cast %7 : vector<1x256xf32> to vector<1x1x256xf32>
    %9 = math.log %8 : vector<1x1x256xf32>
    %cst_6 = arith.constant dense<0.000000e+00> : vector<1x256xf32>
    %10 = vector.multi_reduction <add>, %1, %cst_6 [1] : vector<1x4x256xf32> to vector<1x256xf32>
    %11 = vector.shape_cast %10 : vector<1x256xf32> to vector<1x1x256xf32>
    %12 = arith.mulf %1, %0 : vector<1x4x256xf32>
    %cst_7 = arith.constant dense<0.000000e+00> : vector<1x256xf32>
    %13 = vector.multi_reduction <add>, %12, %cst_7 [1] : vector<1x4x256xf32> to vector<1x256xf32>
    %14 = vector.shape_cast %13 : vector<1x256xf32> to vector<1x1x256xf32>
    %15 = arith.addf %3, %9 : vector<1x1x256xf32>
    %16 = arith.mulf %15, %11 : vector<1x1x256xf32>
    %17 = arith.subf %16, %14 : vector<1x1x256xf32>
    %c0_i32 = arith.constant 0 : i32
    %18 = arith.cmpi eq, %arg1, %c0_i32 : i32
    %19 = arith.extui %18 : i1 to i32
    %c0_i32_8 = arith.constant 0 : i32
    %20 = arith.cmpi ne, %19, %c0_i32_8 : i32
    scf.if %20 {
      %cst_15 = arith.constant 0.000000e+00 : f32
      %24 = vector.broadcast %cst_15 : f32 to vector<1x1x256xf32>
      %c0_16 = arith.constant 0 : index
      %c0_17 = arith.constant 0 : index
      %c0_18 = arith.constant 0 : index
      %25 = vector.load %arg4[%c0_16, %c0_17, %c0_18] : memref<1x1x256xf32, #tpu.memory_space<vmem>>, vector<1x1x256xf32>
      tpu.vector_store %arg4[%c0_16, %c0_17, %c0_18], %24 {strides = array<i32>} : memref<1x1x256xf32, #tpu.memory_space<vmem>>, vector<1x1x256xf32>,
    } else {
    }
    %c0_9 = arith.constant 0 : index
    %c0_10 = arith.constant 0 : index
    %c0_11 = arith.constant 0 : index
    %21 = vector.load %arg4[%c0_9, %c0_10, %c0_11] : memref<1x1x256xf32, #tpu.memory_space<vmem>>, vector<1x1x256xf32>
    %22 = arith.addf %21, %17 : vector<1x1x256xf32>
    %c0_12 = arith.constant 0 : index
    %c0_13 = arith.constant 0 : index
    %c0_14 = arith.constant 0 : index
    %23 = vector.load %arg4[%c0_12, %c0_13, %c0_14] : memref<1x1x256xf32, #tpu.memory_space<vmem>>, vector<1x1x256xf32>
    tpu.vector_store %arg4[%c0_12, %c0_13, %c0_14], %22 {strides = array<i32>} : memref<1x1x256xf32, #tpu.memory_space<vmem>>, vector<1x1x256xf32>,
    return
  }
  func.func @transform_0(%arg0: i32, %arg1: i32) -> (i32, i32, i32) {
    %c0_i32 = arith.constant 0 : i32
    %c0_i32_0 = arith.constant 0 : i32
    return %arg0, %c0_i32, %arg1 : i32, i32, i32
  }
  func.func @transform_1(%arg0: i32, %arg1: i32) -> (i32, i32, i32) {
    %c0_i32 = arith.constant 0 : i32
    %c0_i32_0 = arith.constant 0 : i32
    return %arg0, %c0_i32, %arg1 : i32, i32, i32
  }
  func.func @transform_2(%arg0: i32, %arg1: i32) -> (i32, i32, i32) {
    %c0_i32 = arith.constant 0 : i32
    %c0_i32_0 = arith.constant 0 : i32
    %c0_i32_1 = arith.constant 0 : i32
    return %arg0, %c0_i32, %c0_i32_0 : i32, i32, i32
  }
}

</mosaic_0001>

<bundles_post_ra>
// kernel: tpu_custom_call.1
= control target key start
LH: loop header
LB: loop body
LE: loop exit
PB: predicated region body
PF: predicated region fallthrough
CT: control target
= control target key end

     0   :  { %7 = vsyncpa [#allocation3], 0  ;;  %s916_s0 = inlined_call_operand.hbm [shape: f32[2,4,256], index: 0, kind: input, shape index: {}]   ;;  %s917_s1 = inlined_call_operand.hbm [shape: f32[2,4,256], index: 1, kind: input, shape index: {}]   ;;  %s918_s2 = inlined_call_operand.hbm [shape: f32[2,1,256], index: 2, kind: output, shape index: {}]  }
   0x1   :  { %9 = vsyncpa [#allocation3 + $0x1], 0 }
   0x2   :  { %10 = vsyncpa [#allocation6], 0 }
   0x3   :  { %12 = vsyncpa [#allocation6 + $0x1], 0 }
   0x4   :  { %13 = vsyncpa [#allocation4], 0 }
   0x5   :  { %15 = vsyncpa [#allocation4 + $0x1], 0  ;;  %s726_s9 = smov 0   ;;  %s728_s10 = smov 0  }
   0x6   :  { %s730_s11 = smov 0   ;;  %s732_s12 = smov 0  }
   0x7   :  { %s734_s13 = smov 0   ;;  %s736_s14 = smov 0  }
   0x8 LB: > { %s465_s15 = sadd.s32 4294967295, %s704_s14   ;;  %s466_s16 = sadd.s32 4294967294, %s704_s14   ;;  %s704_s14 = sphi %s736_s14, %s21_s14   ;;  %s700_s13 = sphi %s734_s13, %s932_s13   ;;  %s696_s12 = sphi %s732_s12, %s931_s12   ;;  %s692_s11 = sphi %s730_s11, %s930_s11   ;;  %s688_s10 = sphi %s728_s10, %s929_s10   ;;  %s684_s9 = sphi %s726_s9, %s928_s9  }
   0x9   : > { %s33_s17 = sadd.s32 1, %s700_s13  ;;  %s42_s18 = sadd.s32 1, %s692_s11 }
   0xa   : > { %p35_p0 = scmp.ge.s32.totalorder %s33_s17, 2  ;;  %p49_p1 = scmp.ne.s32.totalorder %s692_s11, %s688_s10 }
   0xb   : > { %p50_p2 = scmp.eq.s32.totalorder %s704_s14, 0  ;;  %p55_p3 = scmp.ne.s32.totalorder %s688_s10, %s684_s9 }
   0xc   : > { %s934_s17 = smov (%p35_p0, %s33_s17), 0  ;;  %p56_p5 = scmp.eq.s32.totalorder %s465_s15, 0 }
   0xd   : > { %p767_p4 = por %p50_p2, %p49_p1  ;;  %s37_s20 = ssub.s32 %s700_s13, %s934_s17 }
   0xe   : > { %p107_p6 = scmp.eq.s32.totalorder %s465_s15, 1  ;;  %p40_p7 = scmp.eq.s32.totalorder %s37_s20, 0 }
   0xf   : > { %p773_p8 = por %p56_p5, %p55_p3  ;;  %p113_p10 = scmp.eq.s32.totalorder %s466_s16, 1 }
  0x10   : > { %p777_p9 = por %p107_p6, %p49_p1  ;;  %p504_p13 = scmp.lt.s32.totalorder %s704_s14, 2 }
  0x11   : > { %s782_s23 = scalar_select %p40_p7, %s692_s11, %s42_s18  }
  0x12   : > { %p784_p11 = por %p113_p10, %p55_p3  ;;  %s791_s25 = sand.u32 1, %s692_s11  }
  0x13   : > { %s469_s26 = sshll.u32 %s791_s25, 3  ;;  %s484_s27 = sshll.u32 %s700_s13, 7 }
  0x14   : > { %s145_s30 = scalar_lea.hbm %s916_s0, %s484_s27  ;;  %s137_s3 = scalar_lea.vmem [#allocation2], %s469_s26 }
  0x15   : > { %s147_s4 = sshll.u32 %s137_s3, 4  ;;  %p800_p0 = pnand %p504_p13, %p767_p4  ;;  %s148_s4 = int_to_ptr.vmem [resolvable:$true] %s147_s4 }
  0x16   : > { %p475_p1 = scmp.ge.s32.totalorder %s704_s14, 1  ;;  %p173_p2 = scmp.lt.s32.totalorder %s704_s14, 3 }
  0x17   : > { %s134_s6 = scalar_lea.sflag [#allocation3], %s791_s25  ;;  %p566_p3 = pneg %p800_p0 }
  0x18   : > { %s577_s7 = scalar_lea.vmem %s148_s4, 128  ;;  %s706_s8 = smov [#allocation2]  }
  0x19   : > { %p578_p5 = scmp.ne.s32.totalorder %s148_s4, %s577_s7  ;;  %s582_s15 = sshll.u32 %s706_s8, 4  ;;  %s583_s15 = int_to_ptr.vmem [resolvable:$false] %s582_s15 }
  0x1a   : > { %s584_s16 = scalar_lea.vmem %s583_s15, 256  ;;  %p585_p4 = scmp.lt.s32.totalorder %s148_s4, %s583_s15 }
  0x1b   : > { %p580_p6 = pnand %p578_p5, %p566_p3  ;;  %p586_p10 = scmp.lt.s32.totalorder %s584_s16, %s577_s7 }
  0x1d   : > { %p581_p7 = pneg %p580_p6  ;;  %p587_p13 = por %p586_p10, %p585_p4 }
  0x1f   : > { %p588_p12 = pnand %p587_p13, %p581_p7 }
  0x21   : > { %591 = shalt.err (!%p588_p12)
}
  0x22   : > { %496 = dma.hbm_to_vmem [thread:$0]  (!%p800_p0), %s145_s30, 128, %s148_s4, %s134_s6  }
  0x23   : > { %p818_p5 = pnand %p475_p1, %p173_p2  ;;  %s166_s28 = scalar_lea.hbm %s917_s1, %s484_s27 }
  0x24   : > { %s158_s29 = scalar_lea.vmem [#allocation5], %s469_s26  ;;  %s155_s7 = scalar_lea.sflag [#allocation6], %s791_s25 }
  0x25   : > { %s168_s3 = sshll.u32 %s158_s29, 4  ;;  %s707_s30 = smov [#allocation5]   ;;  %s169_s3 = int_to_ptr.vmem [resolvable:$true] %s168_s3 }
  0x26   : > { %s605_s8 = scalar_lea.vmem %s169_s3, 128  ;;  %s610_s4 = sshll.u32 %s707_s30, 4  ;;  %s611_s4 = int_to_ptr.vmem [resolvable:$false] %s610_s4 }
  0x27   : > { %p606_p12 = scmp.ne.s32.totalorder %s169_s3, %s605_s8  ;;  %s612_s6 = scalar_lea.vmem %s611_s4, 256 }
  0x28   : > { %p613_p1 = scmp.lt.s32.totalorder %s169_s3, %s611_s4  ;;  %p614_p2 = scmp.lt.s32.totalorder %s612_s6, %s605_s8 }
  0x29   : > { %p608_p6 = pnand %p606_p12, %p566_p3 }
  0x2a   : > { %p615_p4 = por %p614_p2, %p613_p1 }
  0x2b   : > { %p609_p7 = pneg %p608_p6 }
  0x2d   : > { %p616_p10 = pnand %p615_p4, %p609_p7 }
  0x2f   : > { %619 = shalt.err (!%p616_p10)
}
  0x30   : > { %499 = dma.hbm_to_vmem [thread:$0]  (!%p800_p0), %s166_s28, 128, %s169_s3, %s155_s7  }
  0x31   : > { %177 = sbr.rel (%p818_p5) target bundleno = 151 (0x97), region = 28  ;;  %s834_s25 = sand.u32 (!%p818_p5), 1, %s688_s10  }
  0x32   : > { %s476_s26 = sshll.u32 (!%p818_p5), %s834_s25, 3  ;;  %s180_s27 = scalar_lea.sflag (!%p818_p5), [#allocation3], %s834_s25 }
  0x33   : > { %s183_s15 = scalar_lea.vmem (!%p818_p5), [#allocation2], %s476_s26 }
  0x36   : > { %671 = dma.done.wait (%p773_p8), %s180_s27, 128  }
  0x37   : > { %673 = vsyncadd (%p773_p8), %s180_s27, 4294967168  ;;  %s189_s5 = scalar_lea.sflag [#allocation6], %s834_s25  ;;  %s192_s16 = scalar_lea.vmem [#allocation5], %s476_s26 }
  0x38   : > { %675 = dma.done.wait (%p773_p8), %s189_s5, 128  }
  0x39   : > { %677 = vsyncadd (%p773_p8), %s189_s5, 4294967168  ;;  %s478_s18 = sshll.u32 %s834_s25, 1  ;;  %v313_v0 = vlaneseq  ;;  %v708_v2 = vmov 0.0   ;;  %vm225_vm1 = vcmask 1043456   ;;  %v220_v3 = vld [vmem:[%s183_s15] sm:$0xff]  ;;  %v221_v22 = vld [vmem:[%s192_s16] sm:$0xff] }
  0x3a   : > { %s853_s19 = scalar_lea.vmem [#allocation7], %s478_s18  ;;  %v223_v4 = vcombine.high %v220_v3, %v220_v3  ;;  %v226_v5 = vsel %vm225_vm1, %v220_v3, -inf  ;;  %v285_v26 = vmul.f32 %v221_v22, %v220_v3  ;;  %v269_v29 = vcombine.high %v221_v22, %v221_v22  ;;  %s486_s21 = sshll.u32 %s696_s12, 5 }
  0x3b   : > { %vm849_vm0 = vcmp.lt.s32.totalorder %v313_v0, 256  ;;  %v227_v6 = vrot.slane %v226_v5, 4  ;;  %v271_v32 = vsel %vm225_vm1, %v221_v22, 0.0  ;;  %s358_s20 = sshll.u32 %s853_s19, 4  ;;  %s356_s3 = scalar_lea.hbm %s918_s2, %s486_s21  ;;  %s359_s20 = int_to_ptr.vmem [resolvable:$true] %s358_s20 }
  0x3c   : > { %317 = vst.msk [vmem:[%s853_s19] sm:$0x3] %vm849_vm0, %v708_v2  ;;  %v233_v7 = vsel %vm225_vm1, %v223_v4, -inf  ;;  %v287_v33 = vcombine.high %v285_v26, %v285_v26  ;;  %v278_v36 = vsel %vm225_vm1, %v269_v29, 0.0  ;;  %v289_v37 = vsel %vm225_vm1, %v285_v26, 0.0  ;;  %s344_s7 = scalar_lea.sflag [#allocation4], %s834_s25 }
  0x3d   : > { %v228_v8 = vmax.f32 %v226_v5, %v227_v6  ;;  %v234_v9 = vrot.slane %v233_v7, 4  ;;  %v272_v40 = vrot.slane %v271_v32, 4  ;;  %v279_v44 = vrot.slane %v278_v36, 4  ;;  %s620_s8 = scalar_lea.vmem %s359_s20, 32  ;;  %s710_s30 = smov [#allocation7]  }
  0x3e   : > { %v296_v41 = vsel %vm225_vm1, %v287_v33, 0.0  ;;  %v290_v45 = vrot.slane %v289_v37, 4  ;;  %p621_p8 = scmp.ne.s32.totalorder %s359_s20, %s620_s8  ;;  %s624_s4 = sshll.u32 %s710_s30, 4  ;;  %s625_s4 = int_to_ptr.vmem [resolvable:$false] %s624_s4 }
  0x3f   : > { %v229_v10 = vrot.slane %v228_v8, 2  ;;  %v235_v11 = vmax.f32 %v233_v7, %v234_v9  ;;  %v273_v48 = vadd.f32 %v272_v40, %v271_v32  ;;  %v297_v49 = vrot.slane %v296_v41, 4  ;;  %s626_s12 = scalar_lea.vmem %s625_s4, 64  ;;  %p627_p13 = scmp.lt.s32.totalorder %s359_s20, %s625_s4 }
  0x40   : > { %v280_v51 = vadd.f32 %v279_v44, %v278_v36  ;;  %v291_v52 = vadd.f32 %v290_v45, %v289_v37  ;;  %v709_v7 = vmov 1966171168   ;;  %p622_p0 = pnand %p621_p8, %p777_p9  ;;  %p628_p5 = scmp.lt.s32.totalorder %s626_s12, %s620_s8 }
  0x41   : > { %v230_v12 = vmax.f32 %v228_v8, %v229_v10  ;;  %v236_v13 = vrot.slane %v235_v11, 2  ;;  %v274_v53 = vrot.slane %v273_v48, 2  ;;  %v298_v54 = vadd.f32 %v297_v49, %v296_v41 }
  0x42   : > { %v281_v55 = vrot.slane %v280_v51, 2  ;;  %v292_v56 = vrot.slane %v291_v52, 2  ;;  %v323_v8 = vunpack.c.l.s4 %v709_v7  ;;  %p623_p3 = pneg %p622_p0  ;;  %p629_p12 = por %p628_p5, %p627_p13 }
  0x43   : > { %v231_v14 = vrot.slane %v230_v12, 1  ;;  %v237_v15 = vmax.f32 %v235_v11, %v236_v13  ;;  %v275_v57 = vadd.f32 %v274_v53, %v273_v48  ;;  %v299_v58 = vrot.slane %v298_v54, 2 }
  0x44   : > { %v282_v59 = vadd.f32 %v281_v55, %v280_v51  ;;  %v293_v60 = vadd.f32 %v292_v56, %v291_v52  ;;  %p630_p6 = pnand %p629_p12, %p623_p3 }
  0x45   : > { %v232_v16 = vmax.f32 %v230_v12, %v231_v14  ;;  %v238_v17 = vrot.slane %v237_v15, 1  ;;  %v276_v61 = vrot.slane %v275_v57, 1  ;;  %v300_v62 = vadd.f32 %v299_v58, %v298_v54 }
  0x46   : > { %v283_v63 = vrot.slane %v282_v59, 1  ;;  %v294_v2 = vrot.slane %v293_v60, 1  ;;  %v326_v14 = vshrl.u32 %v313_v0, 7 }
  0x47   : > { %v860_v18 = vmax.f32 %v237_v15, %v238_v17  ;;  %v277_v5 = vadd.f32 %v276_v61, %v275_v57  ;;  %v301_v6 = vrot.slane %v300_v62, 1 }
  0x48   : > { %v284_v11 = vadd.f32 %v283_v63, %v282_v59  ;;  %v295_v12 = vadd.f32 %v294_v2, %v293_v60 }
  0x49   : > { %v242_v19 = vcombine.low %v232_v16, %v860_v18  ;;  %v302_v15 = vadd.f32 %v301_v6, %v300_v62 }
  0x4b   : > { %v244_v20 = vsub.f32 %v220_v3, %v242_v19 }
  0x4d   : > { %v245_v21 = vmul.f32 1.442695, %v244_v20  ;;  %v324_v20 = vunpack.c.0.s8 %v323_v8 }
  0x4f   : > { %558 = vpow2.f32 %v245_v21 }
  0x5c   : > { %v559_v23 = vpop.eup %558 }
  0x5d   : > { %v248_v24 = vcombine.high %v559_v23, %v559_v23  ;;  %v250_v25 = vsel %vm225_vm1, %v559_v23, 0.0 }
  0x5e   : > { %v251_v27 = vrot.slane %v250_v25, 4 }
  0x5f   : > { %v257_v28 = vsel %vm225_vm1, %v248_v24, 0.0  ;;  %v327_v24 = vsub.s32 %v324_v20, %v326_v14 }
  0x60   : > { %v252_v30 = vadd.f32 %v251_v27, %v250_v25  ;;  %v258_v31 = vrot.slane %v257_v28, 4  ;;  %v318_v27 = vld [vmem:[%s853_s19] sm:$0x3] }
  0x62   : > { %v253_v34 = vrot.slane %v252_v30, 2  ;;  %v259_v35 = vadd.f32 %v258_v31, %v257_v28 }
  0x64   : > { %v254_v38 = vadd.f32 %v253_v34, %v252_v30  ;;  %v260_v39 = vrot.slane %v259_v35, 2 }
  0x66   : > { %v255_v42 = vrot.slane %v254_v38, 1  ;;  %v261_v43 = vadd.f32 %v260_v39, %v259_v35 }
  0x68   : > { %v256_v46 = vadd.f32 %v255_v42, %v254_v38  ;;  %v262_v47 = vrot.slane %v261_v43, 1 }
  0x6a   : > { %v263_v50 = vadd.f32 %v262_v47, %v261_v43  ;;  %560 = vlog2.f32 %v256_v46 }
  0x6c   : > { %562 = vlog2.f32 %v263_v50 }
  0x77   : > { %v561_v3 = vpop.eup %560 }
  0x78   : > { %v265_v4 = vmul.f32 0.6931472, %v561_v3 }
  0x79   : > { %v563_v9 = vpop.eup %562 }
  0x7a   : > { %v267_v10 = vmul.f32 0.6931472, %v563_v9  ;;  %v303_v13 = vadd.f32 %v265_v4, %v232_v16 }
  0x7c   : > { %v304_v17 = vadd.f32 %v267_v10, %v860_v18  ;;  %v305_v19 = vmul.f32 %v303_v13, %v277_v5 }
  0x7e   : > { %v306_v21 = vmul.f32 %v304_v17, %v284_v11  ;;  %v307_v22 = vsub.f32 %v305_v19, %v295_v12 }
  0x80   : > { %v308_v23 = vsub.f32 %v306_v21, %v302_v15 }
  0x82   : > { %v321_v25 = vcombine.low %v307_v22, %v308_v23 }
  0x84   : > { %v328_v26 = vrot.slane %v321_v25, %v327_v24 }
  0x86   : > { %v335_v16 = vrot.slane %v328_v26, %v327_v24 }
  0x88   : > { %v337_v28 = vadd.f32 %v335_v16, %v318_v27 }
  0x8a   : > { %342 = vst.msk [vmem:[%s853_s19] sm:$0x3] %vm849_vm0, %v337_v28 }
  0x8b   : > { %633 = shalt.err (!%p630_p6)
}
  0x8c   : > { %s634_s6 = scalar_lea.hbm %s356_s3, 32  ;;  %s638_s27 = scalar_lea.hbm %s918_s2, 64 }
  0x8d   : > { %p635_p7 = scmp.ne.s32.totalorder %s356_s3, %s634_s6  ;;  %p639_p4 = scmp.lt.s32.totalorder %s356_s3, %s918_s2 }
  0x8e   : > { %p640_p10 = scmp.lt.s32.totalorder %s638_s27, %s634_s6 }
  0x8f   : > { %p636_p1 = pnand %p635_p7, %p777_p9 }
  0x90   : > { %p641_p8 = por %p640_p10, %p639_p4 }
  0x91   : > { %p637_p2 = pneg %p636_p1 }
  0x93   : > { %p642_p0 = pnand %p641_p8, %p637_p2 }
  0x95   : > { %645 = shalt.err (!%p642_p0)
}
  0x96   : > { %491 = dma.vmem_to_hbm [thread:$0]  (%p777_p9), %s359_s20, 32, %s356_s3, %s344_s7  }
  0x97 PF: > { %s370_s16 = sand.u32 1, %s684_s9   ;;  %p927_p3 = scmp.ge.s32.totalorder %s704_s14, 2 }
  0x98   : > { %s371_s18 = scalar_lea.sflag [#allocation4], %s370_s16 }
  0x99   : > { %p501_p13 = pnand %p927_p3, %p784_p11 }
  0x9b   : > { %p502_p5 = pneg %p501_p13 }
  0x9d   : > { %679 = dma.done.wait (%p502_p5), %s371_s18, 32  }
  0x9e   : > { %681 = vsyncadd (%p502_p5), %s371_s18, 4294967264  ;;  %s21_s14 = sadd.s32 1, %s704_s14   ;;  %s928_s9 = smov %s688_s10 }
  0x9f   : > { %p18_p12 = scmp.ge.s32.totalorder %s21_s14, 4   ;;  %s929_s10 = smov %s692_s11 }
  0xa0   : > { %s930_s11 = smov %s782_s23  ;;  %s931_s12 = smov %s700_s13 }
  0xa1   : > { %s932_s13 = smov %s934_s17  ;;  %20 = sbr.rel (!%p18_p12) target bundleno = 8 (0x8), region = 90 }
  0xa6   :  { %376 = vsyncpa [#allocation3], 1 }
  0xa7   :  { %378 = vsyncpa [#allocation3 + $0x1], 1 }
  0xa8   :  { %379 = vsyncpa [#allocation6], 1 }
  0xa9   :  { %381 = vsyncpa [#allocation6 + $0x1], 1 }
  0xaa   :  { %382 = vsyncpa [#allocation4], 1 }
  0xab   :  { %384 = vsyncpa [#allocation4 + $0x1], 1 }

</bundles_post_ra>
